<compile_context>
chip_gen: v7x
topology: tpu7x:2x2x1
jax: 0.10.0
libtpu: 0.0.40
codegen_flags: <defaults>
</compile_context>

<pallas_src>
import functools

import jax
import jax.numpy as jnp
from jax.experimental import pallas as pl
from jax.experimental.pallas import tpu as pltpu


def _round_up(x, m):
    return (x + m - 1) // m * m


def _gpt2_embed_kernel(tile_s, ids_ref, wte_hbm, wpe_ref, out_ref, row_buf, sem):
    # ids_ref : (B, S_pad) int32   scalar-prefetched, lives in SMEM
    # wte_hbm : (V, D)             stays in HBM (memory_space=pl.ANY)
    # wpe_ref : (tile_s, D)        position rows for this seq tile (resident across b)
    # out_ref : (1, tile_s, D)
    # row_buf : (2, tile_s, D)     VMEM double buffer for gathered wte rows
    # sem     : (2,) DMA sems      one shared semaphore per buffer slot
    j = pl.program_id(0)           # seq tile (outer, "parallel")
    b = pl.program_id(1)           # batch    (inner, "arbitrary", carries the prefetch chain)
    n_b = pl.num_programs(1)
    vocab = wte_hbm.shape[0]
    s0 = j * tile_s

    def row_copy(slot, batch, k):
        # Explicit OOB policy: clamp token ids into [0, V-1].
        tok = jnp.clip(ids_ref[batch, s0 + k], 0, vocab - 1)
        return pltpu.make_async_copy(
            wte_hbm.at[tok], row_buf.at[slot, k], sem.at[slot])

    def issue_tile(slot, batch):
        @pl.loop(0, tile_s)
        def _(k):
            row_copy(slot, batch, k).start()

    slot = b % 2

    # Prime the pipeline at the start of each inner (batch) chain.
    @pl.when(b == 0)
    def _():
        issue_tile(slot, b)

    # Prefetch the next batch's rows for this seq tile while we process the
    # current one; their DMAs stay in flight through the add/store below.
    @pl.when(b + 1 < n_b)
    def _():
        issue_tile(1 - slot, b + 1)

    # Wait for the current tile's gathered rows (descriptors rebuilt with the
    # exact same src/dst slices used when they were issued).
    @pl.loop(0, tile_s)
    def _(k):
        row_copy(slot, b, k).wait()

    # token_embeds + position_embeds (dropout = identity in eval mode).
    out_ref[0, :, :] = (row_buf[slot] + wpe_ref[...]).astype(out_ref.dtype)


def gpt2_embeddings(input_ids, wte, wpe, *, seq_tile=256):
    """Pallas GPT2Embeddings forward: wte[ids] + wpe[arange(S)] (eval dropout)."""
    B, S = input_ids.shape
    V, D = wte.shape
    P, _ = wpe.shape
    assert S <= P, "seq_len exceeds max_position_embeddings"
    assert wte.dtype == wpe.dtype, "wte/wpe dtypes must match"
    dtype = wte.dtype

    # Sequence tile: multiple of 8, capped by seq_tile; pad S up to a multiple
    # of it so blocks always satisfy the (8, 128) rule and stores stay dense.
    tile_s = _round_up(min(seq_tile, _round_up(S, 8)), 8)
    s_pad = _round_up(S, tile_s)
    num_s_tiles = s_pad // tile_s

    ids = input_ids.astype(jnp.int32)
    if s_pad != S:
        ids = jnp.pad(ids, ((0, 0), (0, s_pad - S)))

    # Normalize wpe to exactly (s_pad, D); padded tail rows are never kept.
    if P >= s_pad:
        wpe_p = wpe[:s_pad]
    else:
        wpe_p = jnp.pad(wpe, ((0, s_pad - P), (0, 0)))

    kernel = functools.partial(_gpt2_embed_kernel, tile_s)

    out = pl.pallas_call(
        kernel,
        out_shape=jax.ShapeDtypeStruct((B, s_pad, D), dtype),
        grid_spec=pltpu.PrefetchScalarGridSpec(
            num_scalar_prefetch=1,                 # input_ids -> SMEM (next-tile prefetch needs them)
            grid=(num_s_tiles, B),                 # seq tile outer, batch inner (wpe stays resident)
            in_specs=[
                # wte stays in HBM; rows are gathered by manual DMA.
                pl.BlockSpec(memory_space=pl.ANY),
                # wpe rows for this seq tile; index depends only on the outer axis.
                pl.BlockSpec((tile_s, D), lambda j, b, ids: (j, 0)),
            ],
            out_specs=pl.BlockSpec((1, tile_s, D), lambda j, b, ids: (b, j, 0)),
            scratch_shapes=[
                pltpu.VMEM((2, tile_s, D), dtype),     # double-buffered gather landing buffer
                pltpu.SemaphoreType.DMA((2,)),         # one shared DMA sem per slot
            ],
        ),
        compiler_params=pltpu.CompilerParams(
            dimension_semantics=("parallel", "arbitrary")),
    )(ids, wte, wpe_p)

    return out[:, :S, :] if s_pad != S else out


if __name__ == "__main__":
    # Small, deterministic GPT2-like config (synthetic, not a checkpoint).
    # n_embd=128 keeps the output block lane-dense (real GPT-2's D=768 is
    # also a multiple of 128).
    vocab_size = 128
    max_position_embeddings = 64
    n_embd = 128
    batch, seq_len = 2, 8

    key = jax.random.PRNGKey(0)
    k_ids, k_wte, k_wpe = jax.random.split(key, 3)

    input_ids = jax.random.randint(
        k_ids, (batch, seq_len), 0, vocab_size, dtype=jnp.int32)
    wte = 0.02 * jax.random.normal(k_wte, (vocab_size, n_embd), jnp.float32)
    wpe = 0.01 * jax.random.normal(
        k_wpe, (max_position_embeddings, n_embd), jnp.float32)

    out = gpt2_embeddings(input_ids, wte, wpe)
    out = jax.block_until_ready(out)

    # Reference check (plain JAX): wte[ids] + wpe[arange(S)]
    ref = wte[input_ids] + wpe[jnp.arange(seq_len)][None, :, :]
    assert out.shape == (batch, seq_len, n_embd)
    assert out.dtype == wte.dtype
    assert jnp.allclose(out, ref, atol=1e-5), "mismatch vs reference"

    print("KERNEL_OK")
</pallas_src>

<mosaic_0001>
module attributes {stable_mosaic.version = 11 : i64} {
  func.func @_gpt2_embed_kernel(%arg0: i32, %arg1: i32, %arg2: memref<2x8xi32, #tpu.memory_space<smem>>, %arg3: memref<128x128xf32, #tpu.memory_space<any>>, %arg4: memref<8x128xf32, #tpu.memory_space<vmem>>, %arg5: memref<1x8x128xf32, #tpu.memory_space<vmem>>, %arg6: memref<2x8x128xf32, #tpu.memory_space<vmem>>, %arg7: memref<2x!tpu.dma_semaphore, #tpu.memory_space<semaphore_mem>>) attributes {dimension_semantics = [#tpu.dimension_semantics<parallel>, #tpu.dimension_semantics<arbitrary>], iteration_bounds = array<i64: 1, 2>, scalar_prefetch = 1 : i64, scratch_operands = 2 : i64, tpu.core_type = #tpu.core_type<tc>, window_params = [{}, {transform_indices = @transform_1, window_bounds = array<i64: 8, 128>}, {transform_indices = @transform_2, window_bounds = array<i64: 1, 8, 128>}]} {
    %c8_i32 = arith.constant 8 : i32
    %0 = arith.muli %arg0, %c8_i32 : i32
    %c2_i32 = arith.constant 2 : i32
    %c0_i32 = arith.constant 0 : i32
    %1 = arith.cmpi eq, %c2_i32, %c0_i32 : i32
    %c1_i32 = arith.constant 1 : i32
    %2 = arith.select %1, %c1_i32, %c2_i32 : i32
    %3 = arith.remsi %arg1, %2 : i32
    %c0_i32_0 = arith.constant 0 : i32
    %4 = arith.cmpi ne, %3, %c0_i32_0 : i32
    %c0_i32_1 = arith.constant 0 : i32
    %5 = arith.cmpi slt, %3, %c0_i32_1 : i32
    %c0_i32_2 = arith.constant 0 : i32
    %6 = arith.cmpi slt, %2, %c0_i32_2 : i32
    %7 = arith.xori %5, %6 : i1
    %8 = arith.andi %7, %4 : i1
    %9 = arith.addi %3, %2 : i32
    %10 = arith.select %8, %9, %3 : i32
    %c0_i32_3 = arith.constant 0 : i32
    %11 = arith.cmpi eq, %arg1, %c0_i32_3 : i32
    %12 = arith.extui %11 : i1 to i32
    %c0_i32_4 = arith.constant 0 : i32
    %13 = arith.cmpi ne, %12, %c0_i32_4 : i32
    scf.if %13 {
      %c0_i32_18 = arith.constant 0 : i32
      %c8_i32_19 = arith.constant 8 : i32
      %27 = arith.addi %c0_i32_18, %c8_i32_19 : i32
      %c1_i32_20 = arith.constant 1 : i32
      scf.for %arg8 = %c0_i32_18 to %27 step %c1_i32_20  : i32 {
        %c1_i32_22 = arith.constant 1 : i32
        %28 = arith.muli %arg8, %c1_i32_22 : i32
        %c0_i32_23 = arith.constant 0 : i32
        %29 = arith.addi %c0_i32_23, %28 : i32
        %30 = arith.addi %0, %29 : i32
        %31 = arith.index_cast %arg1 : i32 to index
        %32 = arith.index_cast %30 : i32 to index
        %33 = memref.load %arg2[%31, %32] : memref<2x8xi32, #tpu.memory_space<smem>>
        %c0_i32_24 = arith.constant 0 : i32
        %c127_i32 = arith.constant 127 : i32
        %34 = arith.maxsi %c0_i32_24, %33 : i32
        %35 = arith.minsi %c127_i32, %34 : i32
        %c0_i32_25 = arith.constant 0 : i32
        %36 = tpu.memref_slice %arg3[%35, %c0_i32_25] : memref<128x128xf32, #tpu.memory_space<any>> -> memref<1x128xf32, #tpu.memory_space<any>>
        %37 = tpu.memref_squeeze %36 : memref<1x128xf32, #tpu.memory_space<any>> -> memref<128xf32, #tpu.memory_space<any>>
        %c0_i32_26 = arith.constant 0 : i32
        %38 = tpu.memref_slice %arg6[%10, %29, %c0_i32_26] : memref<2x8x128xf32, #tpu.memory_space<vmem>> -> memref<1x1x128xf32, #tpu.memory_space<vmem>>
        %39 = tpu.memref_squeeze %38 : memref<1x1x128xf32, #tpu.memory_space<vmem>> -> memref<128xf32, #tpu.memory_space<vmem>>
        %40 = tpu.memref_slice %arg7[%10] : memref<2x!tpu.dma_semaphore, #tpu.memory_space<semaphore_mem>> -> memref<1x!tpu.dma_semaphore, #tpu.memory_space<semaphore_mem>>
        %41 = tpu.memref_squeeze %40 : memref<1x!tpu.dma_semaphore, #tpu.memory_space<semaphore_mem>> -> memref<!tpu.dma_semaphore, #tpu.memory_space<semaphore_mem>>
        tpu.enqueue_dma source(%37 : memref<128xf32, #tpu.memory_space<any>>) target(%39 : memref<128xf32, #tpu.memory_space<vmem>>) target_semaphore(%41 : memref<!tpu.dma_semaphore, #tpu.memory_space<semaphore_mem>>)
      }
      %c8_i32_21 = arith.constant 8 : i32
    } else {
    }
    %c1_i32_5 = arith.constant 1 : i32
    %14 = arith.addi %arg1, %c1_i32_5 : i32
    %c2_i32_6 = arith.constant 2 : i32
    %15 = arith.cmpi slt, %14, %c2_i32_6 : i32
    %16 = arith.extui %15 : i1 to i32
    %c0_i32_7 = arith.constant 0 : i32
    %17 = arith.cmpi ne, %16, %c0_i32_7 : i32
    scf.if %17 {
      %c1_i32_18 = arith.constant 1 : i32
      %27 = arith.subi %c1_i32_18, %10 : i32
      %c1_i32_19 = arith.constant 1 : i32
      %28 = arith.addi %arg1, %c1_i32_19 : i32
      %c0_i32_20 = arith.constant 0 : i32
      %c8_i32_21 = arith.constant 8 : i32
      %29 = arith.addi %c0_i32_20, %c8_i32_21 : i32
      %c1_i32_22 = arith.constant 1 : i32
      scf.for %arg8 = %c0_i32_20 to %29 step %c1_i32_22  : i32 {
        %c1_i32_24 = arith.constant 1 : i32
        %30 = arith.muli %arg8, %c1_i32_24 : i32
        %c0_i32_25 = arith.constant 0 : i32
        %31 = arith.addi %c0_i32_25, %30 : i32
        %32 = arith.addi %0, %31 : i32
        %33 = arith.index_cast %28 : i32 to index
        %34 = arith.index_cast %32 : i32 to index
        %35 = memref.load %arg2[%33, %34] : memref<2x8xi32, #tpu.memory_space<smem>>
        %c0_i32_26 = arith.constant 0 : i32
        %c127_i32 = arith.constant 127 : i32
        %36 = arith.maxsi %c0_i32_26, %35 : i32
        %37 = arith.minsi %c127_i32, %36 : i32
        %c0_i32_27 = arith.constant 0 : i32
        %38 = tpu.memref_slice %arg3[%37, %c0_i32_27] : memref<128x128xf32, #tpu.memory_space<any>> -> memref<1x128xf32, #tpu.memory_space<any>>
        %39 = tpu.memref_squeeze %38 : memref<1x128xf32, #tpu.memory_space<any>> -> memref<128xf32, #tpu.memory_space<any>>
        %c0_i32_28 = arith.constant 0 : i32
        %40 = tpu.memref_slice %arg6[%27, %31, %c0_i32_28] : memref<2x8x128xf32, #tpu.memory_space<vmem>> -> memref<1x1x128xf32, #tpu.memory_space<vmem>>
        %41 = tpu.memref_squeeze %40 : memref<1x1x128xf32, #tpu.memory_space<vmem>> -> memref<128xf32, #tpu.memory_space<vmem>>
        %42 = tpu.memref_slice %arg7[%27] : memref<2x!tpu.dma_semaphore, #tpu.memory_space<semaphore_mem>> -> memref<1x!tpu.dma_semaphore, #tpu.memory_space<semaphore_mem>>
        %43 = tpu.memref_squeeze %42 : memref<1x!tpu.dma_semaphore, #tpu.memory_space<semaphore_mem>> -> memref<!tpu.dma_semaphore, #tpu.memory_space<semaphore_mem>>
        tpu.enqueue_dma source(%39 : memref<128xf32, #tpu.memory_space<any>>) target(%41 : memref<128xf32, #tpu.memory_space<vmem>>) target_semaphore(%43 : memref<!tpu.dma_semaphore, #tpu.memory_space<semaphore_mem>>)
      }
      %c8_i32_23 = arith.constant 8 : i32
    } else {
    }
    %c0_i32_8 = arith.constant 0 : i32
    %c8_i32_9 = arith.constant 8 : i32
    %18 = arith.addi %c0_i32_8, %c8_i32_9 : i32
    %c1_i32_10 = arith.constant 1 : i32
    scf.for %arg8 = %c0_i32_8 to %18 step %c1_i32_10  : i32 {
      %c1_i32_18 = arith.constant 1 : i32
      %27 = arith.muli %arg8, %c1_i32_18 : i32
      %c0_i32_19 = arith.constant 0 : i32
      %28 = arith.addi %c0_i32_19, %27 : i32
      %29 = arith.addi %0, %28 : i32
      %30 = arith.index_cast %arg1 : i32 to index
      %31 = arith.index_cast %29 : i32 to index
      %32 = memref.load %arg2[%30, %31] : memref<2x8xi32, #tpu.memory_space<smem>>
      %c0_i32_20 = arith.constant 0 : i32
      %c127_i32 = arith.constant 127 : i32
      %33 = arith.maxsi %c0_i32_20, %32 : i32
      %34 = arith.minsi %c127_i32, %33 : i32
      %c0_i32_21 = arith.constant 0 : i32
      %35 = tpu.memref_slice %arg3[%34, %c0_i32_21] : memref<128x128xf32, #tpu.memory_space<any>> -> memref<1x128xf32, #tpu.memory_space<any>>
      %36 = tpu.memref_squeeze %35 : memref<1x128xf32, #tpu.memory_space<any>> -> memref<128xf32, #tpu.memory_space<any>>
      %c0_i32_22 = arith.constant 0 : i32
      %37 = tpu.memref_slice %arg6[%10, %28, %c0_i32_22] : memref<2x8x128xf32, #tpu.memory_space<vmem>> -> memref<1x1x128xf32, #tpu.memory_space<vmem>>
      %38 = tpu.memref_squeeze %37 : memref<1x1x128xf32, #tpu.memory_space<vmem>> -> memref<128xf32, #tpu.memory_space<vmem>>
      %39 = tpu.memref_slice %arg7[%10] : memref<2x!tpu.dma_semaphore, #tpu.memory_space<semaphore_mem>> -> memref<1x!tpu.dma_semaphore, #tpu.memory_space<semaphore_mem>>
      %40 = tpu.memref_squeeze %39 : memref<1x!tpu.dma_semaphore, #tpu.memory_space<semaphore_mem>> -> memref<!tpu.dma_semaphore, #tpu.memory_space<semaphore_mem>>
      tpu.wait_dma2 semaphore(%40 : memref<!tpu.dma_semaphore, #tpu.memory_space<semaphore_mem>>) src(%36 : memref<128xf32, #tpu.memory_space<any>>) dst(%38 : memref<128xf32, #tpu.memory_space<vmem>>)
    }
    %c8_i32_11 = arith.constant 8 : i32
    %19 = arith.index_cast %10 : i32 to index
    %c0 = arith.constant 0 : index
    %c0_12 = arith.constant 0 : index
    %20 = vector.load %arg6[%19, %c0, %c0_12] : memref<2x8x128xf32, #tpu.memory_space<vmem>>, vector<1x8x128xf32>
    %21 = vector.shape_cast %20 : vector<1x8x128xf32> to vector<8x128xf32>
    %c0_13 = arith.constant 0 : index
    %c0_14 = arith.constant 0 : index
    %22 = vector.load %arg4[%c0_13, %c0_14] : memref<8x128xf32, #tpu.memory_space<vmem>>, vector<8x128xf32>
    %23 = arith.addf %21, %22 : vector<8x128xf32>
    %c0_15 = arith.constant 0 : index
    %c0_16 = arith.constant 0 : index
    %c0_17 = arith.constant 0 : index
    %24 = vector.load %arg5[%c0_15, %c0_16, %c0_17] : memref<1x8x128xf32, #tpu.memory_space<vmem>>, vector<1x8x128xf32>
    %25 = vector.shape_cast %24 : vector<1x8x128xf32> to vector<8x128xf32>
    %26 = vector.shape_cast %23 : vector<8x128xf32> to vector<1x8x128xf32>
    tpu.vector_store %arg5[%c0_15, %c0_16, %c0_17], %26 {strides = array<i32>} : memref<1x8x128xf32, #tpu.memory_space<vmem>>, vector<1x8x128xf32>,
    return
  }
  func.func @transform_1(%arg0: i32, %arg1: i32, %arg2: memref<2x8xi32, #tpu.memory_space<smem>>) -> (i32, i32) {
    %c0_i32 = arith.constant 0 : i32
    %c0_i32_0 = arith.constant 0 : i32
    return %arg0, %c0_i32 : i32, i32
  }
  func.func @transform_2(%arg0: i32, %arg1: i32, %arg2: memref<2x8xi32, #tpu.memory_space<smem>>) -> (i32, i32, i32) {
    %c0_i32 = arith.constant 0 : i32
    %c0_i32_0 = arith.constant 0 : i32
    return %arg1, %arg0, %c0_i32 : i32, i32, i32
  }
}

</mosaic_0001>

<bundles_post_ra>
// kernel: tpu_custom_call.1
= control target key start
LH: loop header
LB: loop body
LE: loop exit
PB: predicated region body
PF: predicated region fallthrough
CT: control target
= control target key end

     0   :  { %s964_s0 = inlined_call_operand.hbm [shape: s32[2,8], index: 0, kind: input, shape index: {}]   ;;  %s965_s1 = inlined_call_operand.hbm [shape: f32[128,128], index: 1, kind: input, shape index: {}]   ;;  %s966_s2 = inlined_call_operand.hbm [shape: f32[8,128], index: 2, kind: input, shape index: {}]   ;;  %s967_s3 = inlined_call_operand.hbm [shape: f32[2,8,128], index: 3, kind: output, shape index: {}]  }
   0x1   :  { %974 = sst [smem:[#allocation20_spill]] %s966_s2  ;;  %s512_s14 = scalar_lea.hbm %s964_s0, 32 }
   0x2   :  { %p513_p0 = scmp.ne.s32.totalorder %s964_s0, %s512_s14  ;;  %p516_p1 = scmp.lt.u32.totalorder %s512_s14, %s964_s0 }
   0x4   :  { %p518_p2 = pnand %p516_p1, %p513_p0 }
   0x6   :  { %521 = shalt.err (!%p518_p2)  }
   0x7   :  { %s710_s19 = smov [#allocation5]  }
   0x8   :  { %9 = dma.hbm_to_smem %s964_s0, 32, %s710_s19, [#allocation4] }
   0x9   :  { %662 = dma.done.wait [#allocation4], 32 }
   0xa   :  { %663 = vsyncadd [#allocation4], 4294967264 }
   0xb   :  { %11 = sfence }
   0xc   :  { %12 = vsyncpa [#allocation7], 0 }
   0xd   :  { %13 = vsyncpa [#allocation8], 0 }
   0xe   :  { %15 = vsyncpa [#allocation8 + $0x1], 0  ;;  %s747_s22 = smov 0   ;;  %s749_s23 = smov 0  }
   0xf   :  { %s751_s24 = smov 0   ;;  %s753_s25 = smov 0  }
  0x10   :  { %s755_s26 = smov 0   ;;  %s757_s27 = smov 0  }
  0x11 LB: > { %s382_s0 = sadd.s32 4294967295, %s696_s27   ;;  %s383_s28 = sadd.s32 4294967294, %s696_s27   ;;  %s696_s27 = sphi %s757_s27, %s21_s27   ;;  %s692_s26 = sphi %s755_s26, %s993_s26   ;;  %s688_s25 = sphi %s753_s25, %s992_s25   ;;  %s684_s24 = sphi %s751_s24, %s991_s24   ;;  %s680_s23 = sphi %s749_s23, %s990_s23   ;;  %s676_s22 = sphi %s747_s22, %s989_s22  }
  0x12   : > { %s30_s29 = sadd.s32 1, %s692_s26  ;;  %s68_s30 = sadd.s32 1, %s684_s24 }
  0x13   : > { %p31_p3 = scmp.ge.s32.totalorder %s30_s29, 2  ;;  %p78_p4 = scmp.ne.s32.totalorder %s684_s24, %s680_s23 }
  0x14   : > { %p79_p5 = scmp.eq.s32.totalorder %s382_s0, 1  ;;  %p84_p6 = scmp.ne.s32.totalorder %s680_s23, %s676_s22 }
  0x15   : > { %s995_s29 = smov (%p31_p3, %s30_s29), 0  ;;  %p85_p8 = scmp.eq.s32.totalorder %s383_s28, 1 }
  0x16   : > { %p787_p7 = por %p79_p5, %p78_p4  ;;  %s63_s5 = ssub.s32 %s692_s26, %s995_s29 }
  0x17   : > { %p384_p9 = scmp.ge.s32.totalorder %s696_s27, 1  ;;  %p66_p10 = scmp.eq.s32.totalorder %s63_s5, 0 }
  0x18   : > { %s975_s4 = scalar_select %p787_p7, 1, 0 }
  0x19   : > { %p794_p11 = por %p85_p8, %p84_p6  ;;  %p92_p12 = scmp.lt.s32.totalorder %s696_s27, 3 }
  0x1a   : > { %s800_s7 = scalar_select %p66_p10, %s684_s24, %s68_s30  }
  0x1b   : > { %s976_s6 = scalar_select %p794_p11, 1, 0 }
  0x1c   : > { %p802_p13 = pnand %p384_p9, %p92_p12  ;;  %p806_p0 = scmp.eq.s32.totalorder %s382_s0, 0 }
  0x1d   : > { %s711_s10 = smov [#allocation6]   ;;  %s980_s2 = sld [smem:[#allocation20_spill]] }
  0x1e   : > { %s977_s8 = scalar_select %p802_p13, 1, 0 }
  0x1f   : > { %s978_s9 = scalar_select %p806_p0, 1, 0 }
  0x20   : > { %p427_p1 = pneg %p802_p13  ;;  %s107_s11 = sshll.u32 %s711_s10, 4  ;;  %s108_s11 = int_to_ptr.vmem [resolvable:$true] %s107_s11 }
  0x22   : > { %p814_p2 = pnand %p806_p0, %p427_p1 }
  0x23   : > { %s522_s15 = scalar_lea.hbm %s980_s2, 128 }
  0x24   : > { %p523_p3 = scmp.ne.s32.totalorder %s980_s2, %s522_s15  ;;  %p524_p4 = pneg %p814_p2 }
  0x25   : > { %p529_p8 = scmp.lt.u32.totalorder %s522_s15, %s980_s2 }
  0x26   : > { %p525_p5 = pnand %p524_p4, %p523_p3 }
  0x28   : > { %p526_p6 = pneg %p525_p5 }
  0x2a   : > { %p531_p9 = pnand %p529_p8, %p526_p6 }
  0x2c   : > { %534 = shalt.err (!%p531_p9)
}
  0x2d   : > { %s535_s20 = scalar_lea.vmem %s108_s11, 128  ;;  %p543_p11 = scmp.lt.s32.totalorder %s108_s11, %s108_s11 }
  0x2e   : > { %p536_p10 = scmp.ne.s32.totalorder %s108_s11, %s535_s20  ;;  %p544_p7 = scmp.lt.s32.totalorder %s535_s20, %s535_s20 }
  0x30   : > { %p538_p12 = pnand %p536_p10, %p524_p4  ;;  %p545_p0 = por %p544_p7, %p543_p11 }
  0x32   : > { %p539_p1 = pneg %p538_p12 }
  0x34   : > { %p546_p13 = pnand %p545_p0, %p539_p1 }
  0x36   : > { %549 = shalt.err (!%p546_p13)
}
  0x37   : > { %430 = dma.hbm_to_vmem [thread:$0]  (!%p814_p2), %s980_s2, 128, %s108_s11, [#allocation7]  }
  0x38   : > { %p981_p3 = scmp.ne.s32.totalorder %s977_s8, 0 }
  0x39   : > { %p982_p5 = scmp.ne.s32.totalorder (!%p981_p3), %s978_s9, 0 }
  0x3a   : > { %120 = sbr.rel (%p981_p3) target bundleno = 215 (0xd7), region = 24 }
  0x41   : > { %665 = dma.done.wait (%p982_p5), [#allocation7], 128  }
  0x42   : > { %667 = vsyncadd (%p982_p5), [#allocation7], 4294967168  ;;  %s972_s28 = sand.u32 1, %s680_s23   ;;  %p136_p7 = scmp.lt.s32.totalorder %s688_s25, 0 }
  0x43   : > { %s844_s30 = sshll.u32 %s972_s28, 3  ;;  %s137_s5 = ssub.s32 0, %s688_s25 }
  0x44   : > { %s389_s8 = smin.u32 %s688_s25, %s137_s5  ;;  %p392_p13 = scmp.ne.s32.totalorder %s688_s25, 0 }
  0x45   : > { %s139_s10 = sand.u32 1, %s389_s8   ;;  %s852_s13 = smov (!%p392_p13), 0  }
  0x46   : > { %s140_s11 = ssub.s32 0, %s139_s10  ;;  %151 = sbr.rel (%p392_p13) target bundleno = 124 (0x7c), region = 32 }
  0x47   : > { %s997_s11 = smov (!%p136_p7, %s140_s11), %s139_s10 }
  0x48   : > { %p391_p11 = scmp.lt.s32.totalorder %s997_s11, 0  ;;  %s146_s12 = sadd.s32 2, %s997_s11 }
  0x4a   : > { %s999_s12 = smov (!%p391_p11, %s146_s12), %s997_s11 }
  0x4d LB: >> { %s159_s14 = sshra.s32 %s700_s13, 7  ;;  %s164_s15 = sand.u32 127, %s700_s13  ;;  %s700_s13 = sphi %s852_s13, %s157_s13  }
  0x4e   : >> { %s161_s16 = sadd.s32 %s688_s25, %s159_s14  ;;  %s400_s18 = sshll.u32 %s999_s12, 3 }
  0x4f   : >> { %s393_s17 = sshll.u32 %s161_s16, 7  ;;  %s174_s21 = sadd.s32 %s700_s13, %s400_s18 }
  0x50   : >> { %s165_s19 = sadd.s32 %s393_s17, %s164_s15  ;;  %s175_s0 = scalar_lea.vmem [#allocation2], %s174_s21 }
  0x51   : >> { %s166_s20 = sld [smem:[#allocation5 + %s165_s19]]  ;;  %s184_s5 = sshll.u32 %s175_s0, 4  ;;  %s185_s5 = int_to_ptr.vmem [resolvable:$true] %s184_s5 }
  0x52   : >> { %s176_s9 = scalar_lea.sflag [#allocation3], %s999_s12  ;;  %s552_s15 = scalar_lea.hbm %s965_s1, 2048 }
  0x57   : >> { %p167_p0 = scmp.gt.s32.totalorder %s166_s20, 0  ;;  %p394_p2 = scmp.lt.s32.totalorder %s166_s20, 127 }
  0x59   : >> { %s1001_s20 = smov (!%p167_p0, %s166_s20), 0 }
  0x5a   : >> { %s1003_s20 = smov (!%p394_p2, %s1001_s20), 127 }
  0x5b   : >> { %s399_s8 = sshll.u32 %s1003_s20, 4 }
  0x5c   : >> { %s172_s28 = scalar_lea.hbm %s965_s1, %s399_s8 }
  0x5d   : >> { %s550_s2 = scalar_lea.hbm %s172_s28, 16  ;;  %p553_p6 = scmp.lt.u32.totalorder %s172_s28, %s965_s1 }
  0x5e   : >> { %p551_p4 = scmp.ne.s32.totalorder %s172_s28, %s550_s2  ;;  %p554_p8 = scmp.lt.u32.totalorder %s552_s15, %s550_s2 }
  0x5f   : >> { %p556_p10 = scmp.lt.u32.totalorder %s550_s2, %s172_s28 }
  0x60   : >> { %p555_p9 = por %p554_p8, %p553_p6 }
  0x62   : >> { %p557_p12 = por %p556_p10, %p555_p9 }
  0x64   : >> { %p558_p1 = pnand %p557_p12, %p551_p4 }
  0x66   : >> { %561 = shalt.err (!%p558_p1)  }
  0x67   : >> { %s562_s19 = scalar_lea.vmem %s185_s5, 16  ;;  %s712_s20 = smov [#allocation2]  }
  0x68   : >> { %p563_p3 = scmp.ne.s32.totalorder %s185_s5, %s562_s19  ;;  %s564_s21 = sshll.u32 %s712_s20, 4  ;;  %s565_s21 = int_to_ptr.vmem [resolvable:$false] %s564_s21 }
  0x69   : >> { %s566_s0 = scalar_lea.vmem %s565_s21, 256  ;;  %p567_p5 = scmp.lt.s32.totalorder %s185_s5, %s565_s21 }
  0x6a   : >> { %p568_p7 = scmp.lt.s32.totalorder %s566_s0, %s562_s19 }
  0x6c   : >> { %p569_p11 = por %p568_p7, %p567_p5 }
  0x6e   : >> { %p570_p13 = pnand %p569_p11, %p563_p3 }
  0x70   : >> { %573 = shalt.err (!%p570_p13)  }
  0x71   : >> { %187 = dma.hbm_to_vmem [thread:$0]  %s172_s28, 16, %s185_s5, %s176_s9 }
  0x72   : >> { %s157_s13 = sadd.s32 1, %s700_s13  }
  0x73   : >> { %p154_p0 = scmp.ge.s32.totalorder %s157_s13, 8  }
  0x75   : > { %156 = sbr.rel (!%p154_p0) target bundleno = 77 (0x4d), region = 108 }
  0x7c PF: > { %s973_s2 = sadd.s32 1, %s688_s25 }
  0x7d   : > { %p401_p2 = scmp.ge.s32.totalorder %s973_s2, 2 }
  0x7e   : > { %s193_s8 = ssub.s32 (!%p401_p2), 1, %s999_s12  ;;  %s879_s10 = smov (!%p401_p2), 0  }
  0x7f   : > { %192 = sbr.rel (%p401_p2) target bundleno = 182 (0xb6), region = 47 }
  0x86 LB: >> { %s201_s28 = sshra.s32 %s704_s10, 7  ;;  %s206_s9 = sand.u32 127, %s704_s10  ;;  %s704_s10 = sphi %s879_s10, %s199_s10  }
  0x87   : >> { %s983_s2 = sadd.s32 1, %s688_s25  ;;  %s409_s11 = sshll.u32 %s193_s8, 3 }
  0x88   : >> { %s203_s13 = sadd.s32 %s201_s28, %s983_s2  ;;  %s216_s15 = sadd.s32 %s704_s10, %s409_s11 }
  0x89   : >> { %s402_s5 = sshll.u32 %s203_s13, 7  ;;  %s217_s17 = scalar_lea.vmem [#allocation2], %s216_s15 }
  0x8a   : >> { %s207_s14 = sadd.s32 %s402_s5, %s206_s9  ;;  %s226_s18 = sshll.u32 %s217_s17, 4  ;;  %s227_s18 = int_to_ptr.vmem [resolvable:$true] %s226_s18 }
  0x8b   : >> { %s208_s16 = sld [smem:[#allocation5 + %s207_s14]]  ;;  %s218_s28 = scalar_lea.sflag [#allocation3], %s193_s8 }
  0x8c   : >> { %s576_s5 = scalar_lea.hbm %s965_s1, 2048 }
  0x91   : >> { %p209_p4 = scmp.gt.s32.totalorder %s208_s16, 0  ;;  %p403_p6 = scmp.lt.s32.totalorder %s208_s16, 127 }
  0x93   : >> { %s1005_s16 = smov (!%p209_p4, %s208_s16), 0 }
  0x94   : >> { %s1007_s16 = smov (!%p403_p6, %s1005_s16), 127 }
  0x95   : >> { %s408_s19 = sshll.u32 %s1007_s16, 4 }
  0x96   : >> { %s214_s0 = scalar_lea.hbm %s965_s1, %s408_s19 }
  0x97   : >> { %s574_s13 = scalar_lea.hbm %s214_s0, 16  ;;  %p577_p9 = scmp.lt.u32.totalorder %s214_s0, %s965_s1 }
  0x98   : >> { %p575_p8 = scmp.ne.s32.totalorder %s214_s0, %s574_s13  ;;  %p578_p10 = scmp.lt.u32.totalorder %s576_s5, %s574_s13 }
  0x99   : >> { %p580_p1 = scmp.lt.u32.totalorder %s574_s13, %s214_s0 }
  0x9a   : >> { %p579_p12 = por %p578_p10, %p577_p9 }
  0x9c   : >> { %p581_p3 = por %p580_p1, %p579_p12 }
  0x9e   : >> { %p582_p5 = pnand %p581_p3, %p575_p8 }
  0xa0   : >> { %585 = shalt.err (!%p582_p5)  }
  0xa1   : >> { %s586_s16 = scalar_lea.vmem %s227_s18, 16  ;;  %s713_s15 = smov [#allocation2]  }
  0xa2   : >> { %p587_p7 = scmp.ne.s32.totalorder %s227_s18, %s586_s16  ;;  %s588_s17 = sshll.u32 %s713_s15, 4  ;;  %s589_s17 = int_to_ptr.vmem [resolvable:$false] %s588_s17 }
  0xa3   : >> { %s590_s19 = scalar_lea.vmem %s589_s17, 256  ;;  %p591_p11 = scmp.lt.s32.totalorder %s227_s18, %s589_s17 }
  0xa4   : >> { %p592_p13 = scmp.lt.s32.totalorder %s590_s19, %s586_s16 }
  0xa6   : >> { %p593_p0 = por %p592_p13, %p591_p11 }
  0xa8   : >> { %p594_p2 = pnand %p593_p0, %p587_p7 }
  0xaa   : >> { %597 = shalt.err (!%p594_p2)  }
  0xab   : >> { %229 = dma.hbm_to_vmem [thread:$0]  %s214_s0, 16, %s227_s18, %s218_s28 }
  0xac   : >> { %s199_s10 = sadd.s32 1, %s704_s10  }
  0xad   : >> { %p196_p4 = scmp.ge.s32.totalorder %s199_s10, 8  }
  0xaf   : > { %198 = sbr.rel (!%p196_p4) target bundleno = 134 (0x86), region = 119 }
  0xb6 PF: > { %s706_s2 = smov 0  }
  0xb7 LB: >> { %s245_s20 = scalar_lea.sflag [#allocation3], %s999_s12  ;;  %s708_s2 = sphi %s706_s2, %s235_s2  }
  0xb8   : >> { %668 = dma.done.wait %s245_s20, 16 }
  0xb9   : >> { %669 = vsyncadd %s245_s20, 4294967280  ;;  %s235_s2 = sadd.s32 1, %s708_s2  }
  0xba   : >> { %p232_p6 = scmp.ge.s32.totalorder %s235_s2, 8  }
  0xbb   : > { %s410_s10 = sshll.u32 (%p232_p6), %s999_s12, 3  ;;  %v251_v0 = vld [vmem:[#allocation6] sm:$0xff] (%p232_p6)  ;;  %s412_s8 = sshll.u32 (%p232_p6), %s688_s25, 7 }
  0xbc   : > { %234 = sbr.rel (!%p232_p6) target bundleno = 183 (0xb7), region = 130  ;;  %s249_s18 = scalar_lea.vmem (%p232_p6), [#allocation2], %s410_s10 }
  0xbd   : > { %v250_v1 = vld [vmem:[%s249_s18] sm:$0xff] (%p232_p6)  ;;  %s984_s21 = scalar_lea.vmem (%p232_p6), [#allocation9], %s844_s30  ;;  %s913_s9 = scalar_lea.hbm (%p232_p6), %s967_s3, %s412_s8 }
  0xbe   : > { %s269_s0 = sshll.u32 (%p232_p6), %s984_s21, 4  ;;  %v252_v2 = vadd.f32 (%p232_p6), %v251_v0, %v250_v1  ;;  %s985_s5 = smov (%p232_p6), %s984_s21  ;;  %s915_s0 = int_to_ptr.vmem [resolvable:$true] %s269_s0 }
  0xbf   : > { %s986_s12 = sand.u32 (%p232_p6), 1, %s680_s23   ;;  %s598_s25 = scalar_lea.vmem (%p232_p6), %s915_s0, 128 }
  0xc0   : > { %253 = vst [vmem:[%s985_s5] sm:$0xff] (%p232_p6), %v252_v2  ;;  %s255_s11 = scalar_lea.sflag (%p232_p6), [#allocation8], %s986_s12  ;;  %p599_p8 = scmp.ne.s32.totalorder (%p232_p6), %s915_s0, %s598_s25 }
  0xc1   : > { %p987_p9 = scmp.ne.s32.totalorder (%p232_p6), %s975_s4, 0  ;;  %s714_s14 = smov (%p232_p6), [#allocation9]  }
  0xc2   : > { %s602_s16 = sshll.u32 (%p232_p6), %s714_s14, 4  ;;  %s603_s16 = int_to_ptr.vmem [resolvable:$false] %s602_s16 }
  0xc3   : > { %p600_p10 = pnand %p599_p8, %p987_p9  ;;  %s604_s15 = scalar_lea.vmem %s603_s16, 256 }
  0xc4   : > { %p605_p1 = scmp.lt.s32.totalorder %s915_s0, %s603_s16  ;;  %p606_p3 = scmp.lt.s32.totalorder %s604_s15, %s598_s25 }
  0xc5   : > { %p601_p12 = pneg %p600_p10 }
  0xc6   : > { %p607_p5 = por %p606_p3, %p605_p1 }
  0xc8   : > { %p608_p7 = pnand %p607_p5, %p601_p12 }
  0xca   : > { %611 = shalt.err (!%p608_p7)
}
  0xcb   : > { %s612_s30 = scalar_lea.hbm %s913_s9, 128  ;;  %s616_s2 = scalar_lea.hbm %s967_s3, 256 }
  0xcc   : > { %p613_p11 = scmp.ne.s32.totalorder %s913_s9, %s612_s30  ;;  %p617_p2 = scmp.lt.u32.totalorder %s913_s9, %s967_s3 }
  0xcd   : > { %p618_p4 = scmp.lt.u32.totalorder %s616_s2, %s612_s30  ;;  %p620_p8 = scmp.lt.u32.totalorder %s612_s30, %s913_s9 }
  0xce   : > { %p614_p13 = pnand %p613_p11, %p987_p9 }
  0xcf   : > { %p619_p6 = por %p618_p4, %p617_p2 }
  0xd0   : > { %p615_p0 = pneg %p614_p13 }
  0xd1   : > { %p621_p10 = por %p620_p8, %p619_p6 }
  0xd3   : > { %p622_p12 = pnand %p621_p10, %p615_p0 }
  0xd5   : > { %625 = shalt.err (!%p622_p12)
}
  0xd6   : > { %425 = dma.vmem_to_hbm [thread:$0]  (%p987_p9), %s915_s0, 128, %s913_s9, %s255_s11  }
  0xd7 PF: > { %p437_p1 = scmp.ge.s32.totalorder %s696_s27, 2  ;;  %s281_s8 = sand.u32 1, %s676_s22  }
  0xd8   : > { %p988_p3 = scmp.ne.s32.totalorder %s976_s6, 0  ;;  %s282_s18 = scalar_lea.sflag [#allocation8], %s281_s8 }
  0xda   : > { %p432_p5 = pnand %p437_p1, %p988_p3 }
  0xdc   : > { %671 = dma.done.wait (!%p432_p5), %s282_s18, 128  }
  0xdd   : > { %673 = vsyncadd (!%p432_p5), %s282_s18, 4294967168  ;;  %s21_s27 = sadd.s32 1, %s696_s27   ;;  %s989_s22 = smov %s680_s23 }
  0xde   : > { %p18_p7 = scmp.ge.s32.totalorder %s21_s27, 4   ;;  %s990_s23 = smov %s684_s24 }
  0xdf   : > { %s991_s24 = smov %s800_s7  ;;  %s992_s25 = smov %s692_s26 }
  0xe0   : > { %s993_s26 = smov %s995_s29  ;;  %20 = sbr.rel (!%p18_p7) target bundleno = 17 (0x11), region = 141 }
  0xe7   :  { %287 = vsyncpa [#allocation7], 1 }
  0xe8   :  { %289 = vsyncpa [#allocation7 + $0x1], 1 }
  0xe9   :  { %290 = vsyncpa [#allocation8], 1 }
  0xea   :  { %292 = vsyncpa [#allocation8 + $0x1], 1 }
  0xeb   :  { %293 = vsyncmov [#allocation3] }
  0xee   :  { %s294_s4 = vpop.sfrf %293 }
  0xef   :  { %p415_p9 = scmp.ne.s32.totalorder %s294_s4, 0 }
  0xf1   :  { %298 = shalt.err (%p415_p9)  }
  0xf2   :  { %300 = vsyncmov [#allocation3 + $0x1] }
  0xf5   :  { %s301_s6 = vpop.sfrf %300 }
  0xf6   :  { %p416_p11 = scmp.ne.s32.totalorder %s301_s6, 0 }
  0xf8   :  { %305 = shalt.err (%p416_p11)  }

</bundles_post_ra>
